<compile_context>
chip_gen: v5e
topology: v5e:2x2
jax: 0.10.0
libtpu: 0.0.40
codegen_flags: <defaults>
</compile_context>

<pallas_src>
import functools

import jax
import jax.numpy as jnp
from jax import lax
from jax.experimental import pallas as pl
from jax.experimental.pallas import tpu as pltpu


def _reg_loss_kernel(x_ref, o_ref, acc_ref, *, total_b):
    i = pl.program_id(0)

    @pl.when(i == 0)
    def _init():
        acc_ref[...] = jnp.zeros_like(acc_ref)

    # (TB, 24) block; cast to f32 in-register (math in f32 on all generations,
    # v5e's VPU has no bf16 ALUs anyway).
    x = x_ref[...].astype(jnp.float32)
    tb = x_ref.shape[0]

    # v_r = output[:, r, 1:4]  lives at lanes [4r+1, 4r+4) of the flat row.
    v = [x[:, 4 * r + 1:4 * r + 4] for r in range(6)]               # 6 x (TB, 3)
    n2 = [jnp.sum(vr * vr, axis=-1, keepdims=True) for vr in v]     # 6 x (TB, 1)

    def pair_term(a, b):
        d = jnp.sum(v[a] * v[b], axis=-1, keepdims=True)            # (TB, 1)
        # <m_a, m_b>^2 = <v_a, v_b>^2 / (|v_a|^2 |v_b|^2); approx reciprocal
        # runs on the EUP slot (otherwise idle here).
        return (d * d) * pl.reciprocal(n2[a] * n2[b], approx=True)

    s = (pair_term(0, 1) + pair_term(0, 2) + pair_term(1, 2)
         + pair_term(3, 4) + pair_term(3, 5) + pair_term(4, 5))     # (TB, 1)

    # Mask the ragged tail block (select, so NaN/Inf from the padded region
    # never propagates into the reduction). Static no-op when B % TB == 0.
    if total_b % tb != 0:
        row = i * tb + lax.broadcasted_iota(jnp.int32, (tb, 1), 0)
        s = jnp.where(row < total_b, s, 0.0)

    acc_ref[...] += 2.0 * jnp.sum(s, axis=0, keepdims=True)

    @pl.when(i == pl.num_programs(0) - 1)
    def _finalize():
        o_ref[...] = acc_ref[...] * (1.0 / float(total_b))


def regularization_loss(output, *, block_rows=8192):
    """output: (B, 6, 4) array (any float dtype) -> loss of shape (1,), f32."""
    assert output.ndim == 3 and output.shape[1] == 6 and output.shape[2] == 4, (
        "RegularizationLoss expects (batch, 6, 4) input")
    b = output.shape[0]

    # Contiguous, free reshape: lane-dense (B, 24) slab instead of a padded
    # (6, 4) minor tile per batch element.
    x2 = output.reshape(b, 24)

    if b <= block_rows:
        tb = b                      # block dim == full dim: always legal
    else:
        assert block_rows % 8 == 0, "block_rows must be a multiple of 8"
        tb = block_rows
    grid = (pl.cdiv(b, tb),)

    kernel = functools.partial(_reg_loss_kernel, total_b=b)

    out = pl.pallas_call(
        kernel,
        out_shape=jax.ShapeDtypeStruct((1, 1), jnp.float32),
        grid_spec=pltpu.PrefetchScalarGridSpec(
            num_scalar_prefetch=0,
            grid=grid,
            in_specs=[pl.BlockSpec((tb, 24), lambda i: (i, 0))],
            out_specs=pl.BlockSpec((1, 1), lambda i: (0, 0)),
            scratch_shapes=[pltpu.VMEM((1, 1), jnp.float32)],
        ),
        compiler_params=pltpu.CompilerParams(
            dimension_semantics=("arbitrary",)),   # reduction axis
    )(x2)
    return out.reshape(1)


def _reference_loss(x):
    # Pure-JAX reference of the PyTorch forward, for verification.
    v = x[:, :, 1:].astype(jnp.float32)
    m = v / jnp.linalg.norm(v, axis=-1, keepdims=True)
    m1, m2 = m[:, :3, :], m[:, 3:, :]
    eye = jnp.eye(3, dtype=jnp.float32)
    a = jnp.einsum('bij,bkj->bik', m1, m1) - eye
    bm = jnp.einsum('bij,bkj->bik', m2, m2) - eye
    return jnp.reshape((jnp.sum(a ** 2) + jnp.sum(bm ** 2)) / x.shape[0], (1,))


if __name__ == "__main__":
    key = jax.random.PRNGKey(0)

    # Small case implied by the module: batch=2, exactly 6 rows of 4 values.
    x = jax.random.normal(key, (2, 6, 4), dtype=jnp.float32)
    loss = jax.block_until_ready(regularization_loss(x))
    ref = jax.block_until_ready(_reference_loss(x))
    assert loss.shape == (1,)
    # approx reciprocal (EUP) adds a few ULP vs the exact-divide reference.
    assert jnp.allclose(loss, ref, rtol=2e-3, atol=1e-5), (loss, ref)

    # Exercise the gridded + tail-masked path (B=20, 8-row blocks, grid=3).
    x_big = jax.random.normal(jax.random.PRNGKey(0), (20, 6, 4), dtype=jnp.float32)
    loss_big = jax.block_until_ready(regularization_loss(x_big, block_rows=8))
    ref_big = jax.block_until_ready(_reference_loss(x_big))
    assert jnp.allclose(loss_big, ref_big, rtol=2e-3, atol=1e-5), (loss_big, ref_big)

    print("KERNEL_OK")
</pallas_src>

<mosaic_0001>
module attributes {stable_mosaic.version = 11 : i64} {
  func.func @_reg_loss_kernel(%arg0: i32, %arg1: memref<2x24xf32, #tpu.memory_space<vmem>>, %arg2: memref<1x1xf32, #tpu.memory_space<vmem>>, %arg3: memref<1x1xf32, #tpu.memory_space<vmem>>) attributes {dimension_semantics = [#tpu.dimension_semantics<arbitrary>], iteration_bounds = array<i64: 1>, scalar_prefetch = 0 : i64, scratch_operands = 1 : i64, tpu.core_type = #tpu.core_type<tc>, window_params = [{transform_indices = @transform_0, window_bounds = array<i64: 2, 24>}, {pipeline_mode = #tpu.pipeline_mode<synchronous>, transform_indices = @transform_1, window_bounds = array<i64: 1, 1>}]} {
    %c0_i32 = arith.constant 0 : i32
    %0 = arith.cmpi eq, %arg0, %c0_i32 : i32
    %1 = arith.extui %0 : i1 to i32
    %c0_i32_0 = arith.constant 0 : i32
    %2 = arith.cmpi ne, %1, %c0_i32_0 : i32
    scf.if %2 {
      %cst_21 = arith.constant 0.000000e+00 : f32
      %85 = vector.broadcast %cst_21 : f32 to vector<1x1xf32>
      %c0_22 = arith.constant 0 : index
      %c0_23 = arith.constant 0 : index
      %86 = vector.load %arg3[%c0_22, %c0_23] : memref<1x1xf32, #tpu.memory_space<vmem>>, vector<1x1xf32>
      tpu.vector_store %arg3[%c0_22, %c0_23], %85 {strides = array<i32>} : memref<1x1xf32, #tpu.memory_space<vmem>>, vector<1x1xf32>,
    } else {
    }
    %c0 = arith.constant 0 : index
    %c0_1 = arith.constant 0 : index
    %3 = vector.load %arg1[%c0, %c0_1] : memref<2x24xf32, #tpu.memory_space<vmem>>, vector<2x24xf32>
    %4 = vector.extract_strided_slice %3 {offsets = [0, 1], sizes = [2, 3], strides = [1, 1]} : vector<2x24xf32> to vector<2x3xf32>
    %5 = vector.extract_strided_slice %3 {offsets = [0, 5], sizes = [2, 3], strides = [1, 1]} : vector<2x24xf32> to vector<2x3xf32>
    %6 = vector.extract_strided_slice %3 {offsets = [0, 9], sizes = [2, 3], strides = [1, 1]} : vector<2x24xf32> to vector<2x3xf32>
    %7 = vector.extract_strided_slice %3 {offsets = [0, 13], sizes = [2, 3], strides = [1, 1]} : vector<2x24xf32> to vector<2x3xf32>
    %8 = vector.extract_strided_slice %3 {offsets = [0, 17], sizes = [2, 3], strides = [1, 1]} : vector<2x24xf32> to vector<2x3xf32>
    %9 = vector.extract_strided_slice %3 {offsets = [0, 21], sizes = [2, 3], strides = [1, 1]} : vector<2x24xf32> to vector<2x3xf32>
    %10 = arith.mulf %4, %4 : vector<2x3xf32>
    %cst = arith.constant dense<0.000000e+00> : vector<2xf32>
    %11 = vector.multi_reduction <add>, %10, %cst [1] : vector<2x3xf32> to vector<2xf32>
    %12 = vector.shape_cast %11 : vector<2xf32> to vector<2x1xf32>
    %13 = arith.mulf %5, %5 : vector<2x3xf32>
    %cst_2 = arith.constant dense<0.000000e+00> : vector<2xf32>
    %14 = vector.multi_reduction <add>, %13, %cst_2 [1] : vector<2x3xf32> to vector<2xf32>
    %15 = vector.shape_cast %14 : vector<2xf32> to vector<2x1xf32>
    %16 = arith.mulf %6, %6 : vector<2x3xf32>
    %cst_3 = arith.constant dense<0.000000e+00> : vector<2xf32>
    %17 = vector.multi_reduction <add>, %16, %cst_3 [1] : vector<2x3xf32> to vector<2xf32>
    %18 = vector.shape_cast %17 : vector<2xf32> to vector<2x1xf32>
    %19 = arith.mulf %7, %7 : vector<2x3xf32>
    %cst_4 = arith.constant dense<0.000000e+00> : vector<2xf32>
    %20 = vector.multi_reduction <add>, %19, %cst_4 [1] : vector<2x3xf32> to vector<2xf32>
    %21 = vector.shape_cast %20 : vector<2xf32> to vector<2x1xf32>
    %22 = arith.mulf %8, %8 : vector<2x3xf32>
    %cst_5 = arith.constant dense<0.000000e+00> : vector<2xf32>
    %23 = vector.multi_reduction <add>, %22, %cst_5 [1] : vector<2x3xf32> to vector<2xf32>
    %24 = vector.shape_cast %23 : vector<2xf32> to vector<2x1xf32>
    %25 = arith.mulf %9, %9 : vector<2x3xf32>
    %cst_6 = arith.constant dense<0.000000e+00> : vector<2xf32>
    %26 = vector.multi_reduction <add>, %25, %cst_6 [1] : vector<2x3xf32> to vector<2xf32>
    %27 = vector.shape_cast %26 : vector<2xf32> to vector<2x1xf32>
    %28 = arith.mulf %4, %5 : vector<2x3xf32>
    %cst_7 = arith.constant dense<0.000000e+00> : vector<2xf32>
    %29 = vector.multi_reduction <add>, %28, %cst_7 [1] : vector<2x3xf32> to vector<2xf32>
    %30 = vector.shape_cast %29 : vector<2xf32> to vector<2x1xf32>
    %31 = arith.mulf %30, %30 : vector<2x1xf32>
    %32 = arith.mulf %12, %15 : vector<2x1xf32>
    %33 = tpu.reciprocal %32 {approx = true} : vector<2x1xf32> -> vector<2x1xf32>
    %34 = arith.mulf %31, %33 : vector<2x1xf32>
    %35 = arith.mulf %4, %6 : vector<2x3xf32>
    %cst_8 = arith.constant dense<0.000000e+00> : vector<2xf32>
    %36 = vector.multi_reduction <add>, %35, %cst_8 [1] : vector<2x3xf32> to vector<2xf32>
    %37 = vector.shape_cast %36 : vector<2xf32> to vector<2x1xf32>
    %38 = arith.mulf %37, %37 : vector<2x1xf32>
    %39 = arith.mulf %12, %18 : vector<2x1xf32>
    %40 = tpu.reciprocal %39 {approx = true} : vector<2x1xf32> -> vector<2x1xf32>
    %41 = arith.mulf %38, %40 : vector<2x1xf32>
    %42 = arith.addf %34, %41 : vector<2x1xf32>
    %43 = arith.mulf %5, %6 : vector<2x3xf32>
    %cst_9 = arith.constant dense<0.000000e+00> : vector<2xf32>
    %44 = vector.multi_reduction <add>, %43, %cst_9 [1] : vector<2x3xf32> to vector<2xf32>
    %45 = vector.shape_cast %44 : vector<2xf32> to vector<2x1xf32>
    %46 = arith.mulf %45, %45 : vector<2x1xf32>
    %47 = arith.mulf %15, %18 : vector<2x1xf32>
    %48 = tpu.reciprocal %47 {approx = true} : vector<2x1xf32> -> vector<2x1xf32>
    %49 = arith.mulf %46, %48 : vector<2x1xf32>
    %50 = arith.addf %42, %49 : vector<2x1xf32>
    %51 = arith.mulf %7, %8 : vector<2x3xf32>
    %cst_10 = arith.constant dense<0.000000e+00> : vector<2xf32>
    %52 = vector.multi_reduction <add>, %51, %cst_10 [1] : vector<2x3xf32> to vector<2xf32>
    %53 = vector.shape_cast %52 : vector<2xf32> to vector<2x1xf32>
    %54 = arith.mulf %53, %53 : vector<2x1xf32>
    %55 = arith.mulf %21, %24 : vector<2x1xf32>
    %56 = tpu.reciprocal %55 {approx = true} : vector<2x1xf32> -> vector<2x1xf32>
    %57 = arith.mulf %54, %56 : vector<2x1xf32>
    %58 = arith.addf %50, %57 : vector<2x1xf32>
    %59 = arith.mulf %7, %9 : vector<2x3xf32>
    %cst_11 = arith.constant dense<0.000000e+00> : vector<2xf32>
    %60 = vector.multi_reduction <add>, %59, %cst_11 [1] : vector<2x3xf32> to vector<2xf32>
    %61 = vector.shape_cast %60 : vector<2xf32> to vector<2x1xf32>
    %62 = arith.mulf %61, %61 : vector<2x1xf32>
    %63 = arith.mulf %21, %27 : vector<2x1xf32>
    %64 = tpu.reciprocal %63 {approx = true} : vector<2x1xf32> -> vector<2x1xf32>
    %65 = arith.mulf %62, %64 : vector<2x1xf32>
    %66 = arith.addf %58, %65 : vector<2x1xf32>
    %67 = arith.mulf %8, %9 : vector<2x3xf32>
    %cst_12 = arith.constant dense<0.000000e+00> : vector<2xf32>
    %68 = vector.multi_reduction <add>, %67, %cst_12 [1] : vector<2x3xf32> to vector<2xf32>
    %69 = vector.shape_cast %68 : vector<2xf32> to vector<2x1xf32>
    %70 = arith.mulf %69, %69 : vector<2x1xf32>
    %71 = arith.mulf %24, %27 : vector<2x1xf32>
    %72 = tpu.reciprocal %71 {approx = true} : vector<2x1xf32> -> vector<2x1xf32>
    %73 = arith.mulf %70, %72 : vector<2x1xf32>
    %74 = arith.addf %66, %73 : vector<2x1xf32>
    %c0_13 = arith.constant 0 : index
    %c0_14 = arith.constant 0 : index
    %75 = vector.load %arg3[%c0_13, %c0_14] : memref<1x1xf32, #tpu.memory_space<vmem>>, vector<1x1xf32>
    %cst_15 = arith.constant dense<0.000000e+00> : vector<1xf32>
    %76 = vector.multi_reduction <add>, %74, %cst_15 [0] : vector<2x1xf32> to vector<1xf32>
    %77 = vector.shape_cast %76 : vector<1xf32> to vector<1x1xf32>
    %cst_16 = arith.constant 2.000000e+00 : f32
    %78 = vector.broadcast %cst_16 : f32 to vector<1x1xf32>
    %79 = arith.mulf %78, %77 : vector<1x1xf32>
    %80 = arith.addf %75, %79 : vector<1x1xf32>
    %c0_17 = arith.constant 0 : index
    %c0_18 = arith.constant 0 : index
    %81 = vector.load %arg3[%c0_17, %c0_18] : memref<1x1xf32, #tpu.memory_space<vmem>>, vector<1x1xf32>
    tpu.vector_store %arg3[%c0_17, %c0_18], %80 {strides = array<i32>} : memref<1x1xf32, #tpu.memory_space<vmem>>, vector<1x1xf32>,
    %c0_i32_19 = arith.constant 0 : i32
    %82 = arith.cmpi eq, %arg0, %c0_i32_19 : i32
    %83 = arith.extui %82 : i1 to i32
    %c0_i32_20 = arith.constant 0 : i32
    %84 = arith.cmpi ne, %83, %c0_i32_20 : i32
    scf.if %84 {
      %c0_21 = arith.constant 0 : index
      %c0_22 = arith.constant 0 : index
      %85 = vector.load %arg3[%c0_21, %c0_22] : memref<1x1xf32, #tpu.memory_space<vmem>>, vector<1x1xf32>
      %cst_23 = arith.constant 5.000000e-01 : f32
      %86 = vector.broadcast %cst_23 : f32 to vector<1x1xf32>
      %87 = arith.mulf %85, %86 : vector<1x1xf32>
      %c0_24 = arith.constant 0 : index
      %c0_25 = arith.constant 0 : index
      %88 = vector.load %arg2[%c0_24, %c0_25] : memref<1x1xf32, #tpu.memory_space<vmem>>, vector<1x1xf32>
      tpu.vector_store %arg2[%c0_24, %c0_25], %87 {strides = array<i32>} : memref<1x1xf32, #tpu.memory_space<vmem>>, vector<1x1xf32>,
    } else {
    }
    return
  }
  func.func @transform_0(%arg0: i32) -> (i32, i32) {
    %c0_i32 = arith.constant 0 : i32
    %c0_i32_0 = arith.constant 0 : i32
    return %arg0, %c0_i32 : i32, i32
  }
  func.func @transform_1(%arg0: i32) -> (i32, i32) {
    %c0_i32 = arith.constant 0 : i32
    %c0_i32_0 = arith.constant 0 : i32
    %c0_i32_1 = arith.constant 0 : i32
    return %c0_i32, %c0_i32_0 : i32, i32
  }
}

</mosaic_0001>

<bundles_post_ra>
// kernel: tpu_custom_call.1
= control target key start
LH: loop header
LB: loop body
LE: loop exit
PB: predicated region body
PF: predicated region fallthrough
CT: control target
= control target key end

     0   :  { %6 = vsyncpa [#allocation4], 0  ;;  %s298_s0 = inlined_call_operand.hbm [shape: f32[2,24], index: 0, kind: input, shape index: {}]   ;;  %s299_s1 = inlined_call_operand.hbm [shape: f32[1,1], index: 1, kind: output, shape index: {}]  }
   0x1   :  { %7 = vsyncpa [#allocation5], 0  ;;  %s13_s8 = sshll.u32 %s298_s0, 4  ;;  %s256_s9 = smov [#allocation3]   ;;  %s14_s8 = int_to_ptr.hbm [resolvable:$true] %s13_s8 }
   0x2   :  { %s15_s10 = sshll.u32 %s256_s9, 4  ;;  %s16_s10 = int_to_ptr.vmem [resolvable:$true] %s15_s10 }
   0x3   :  { %18 = dma.hbm_to_vmem [thread:$0]  %s14_s8, 32, %s16_s10, [#allocation4]  }
   0x4   :  { %252 = dma.done.wait [#allocation4], 32  }
   0x5   :  { %253 = vsyncadd [#allocation4], 4294967264  ;;  %v29_v0 = vld [vmem:[#allocation3] sm:$0x3]  ;;  %s257_s11 = smov 119   ;;  %s258_s12 = smov 127  }
   0x6   :  { %v30_v1 = vmul.f32 %v29_v0, %v29_v0  ;;  %s259_s13 = smov 123   ;;  %s260_s14 = smov 115   ;;  %vm35_vm0 = vcmask 17408   ;;  %vm27_vm1 = vcmask 0   ;;  %v265_v41 = vmov 0.0  }
   0x7   :  { %s261_s15 = smov 124   ;;  %s262_s0 = smov 111   ;;  %28 = vst.msk [vmem:[#allocation2] sm:$0x1] %vm27_vm1, %v265_v41  ;;  %vm146_vm2 = vcmask 1041408  }
   0x8   :  { %45 = vrot.lane.b32.xlu2 %v30_v1, %s257_s11  ;;  %32 = vrot.lane.b32.xlu0 %v30_v1, %s258_s12  ;;  %s263_s16 = smov 120   ;;  %s264_s17 = smov 107  }
   0x9   :  { %39 = vrot.lane.b32.xlu1 %v30_v1, %s259_s13  ;;  %s266_s18 = smov [#allocation6]   ;;  %s171_s22 = sshll.u32 %s299_s1, 4  ;;  %s172_s22 = int_to_ptr.hbm [resolvable:$true] %s171_s22 }
   0xa   :  { %s169_s19 = sshll.u32 %s266_s18, 4  ;;  %s170_s19 = int_to_ptr.vmem [resolvable:$true] %s169_s19 }
  0x10   :  { %51 = vrot.lane.b32.xlu2 %v30_v1, %s260_s14  ;;  %70 = vrot.lane.b32.xlu0 %v29_v0, %s261_s15 }
  0x11   :  { %57 = vrot.lane.b32.xlu1 %v30_v1, %s262_s0 }
  0x18   :  { %85 = vrot.lane.b32.xlu2 %v29_v0, %s263_s16 }
  0x19   :  { %63 = vrot.lane.b32.xlu1 %v30_v1, %s264_s17 }
  0x62   :  { %v46_v2 = vpop.permute.xlu2 %45 }
  0x63   :  { %v48_v3 = vsel %vm35_vm0, %v46_v2, 0.0 }
  0x64   :  { %49 = vadd.xlane.f32.xlu2 %v48_v3 }
  0x6a   :  { %v52_v4 = vpop.permute.xlu2 %51 }
  0x6b   :  { %v54_v16 = vsel %vm35_vm0, %v52_v4, 0.0 }
  0x72   :  { %v86_v5 = vpop.permute.xlu2 %85 }
  0x73   :  { %v88_v6 = vmul.f32 %v86_v5, %v29_v0 }
  0x75   :  { %90 = vrot.lane.b32.xlu0 %v88_v6, %s258_s12 }
  0x7a   :  { %v33_v7 = vpop.permute.xlu0 %32 }
  0x7b   :  { %v40_v10 = vpop.permute.xlu1 %39  ;;  %v36_v14 = vsel %vm35_vm0, %v33_v7, 0.0 }
  0x7c   :  { %v42_v15 = vsel %vm35_vm0, %v40_v10, 0.0 }
  0x82   :  { %v71_v8 = vpop.permute.xlu0 %70 }
  0x83   :  { %v73_v9 = vmul.f32 %v71_v8, %v29_v0  ;;  %v58_v11 = vpop.permute.xlu1 %57 }
  0x84   :  { %v60_v17 = vsel %vm35_vm0, %v58_v11, 0.0 }
  0x85   :  { %112 = vrot.lane.b32.xlu0 %v73_v9, %s260_s14  ;;  %75 = vrot.lane.b32.xlu1 %v73_v9, %s258_s12 }
  0x8b   :  { %v64_v12 = vpop.permute.xlu1 %63 }
  0x8c   :  { %v66_v13 = vsel %vm35_vm0, %v64_v12, 0.0 }
  0x8d   :  { %134 = vrot.lane.b32.xlu0 %v73_v9, %s262_s0  ;;  %101 = vrot.lane.b32.xlu1 %v73_v9, %s259_s13 }
  0x8e   :  { %67 = vadd.xlane.f32.xlu2 %v66_v13 }
  0x95   :  { %123 = vrot.lane.b32.xlu1 %v88_v6, %s260_s14 }
  0xb7   :  { %37 = vadd.xlane.f32.xlu0 %v36_v14 }
  0xbf   :  { %55 = vadd.xlane.f32.xlu0 %v54_v16  ;;  %43 = vadd.xlane.f32.xlu1 %v42_v15  ;;  %v145_v15 = vld [vmem:[#allocation2] sm:$0x1] }
  0xc7   :  { %61 = vadd.xlane.f32.xlu0 %v60_v17 }
  0xd7   :  { %v50_v30 = vpop.xlane.xlu2 %49 }
  0xe7   :  { %v91_v18 = vpop.permute.xlu0 %90 }
  0xe8   :  { %v93_v19 = vsel %vm35_vm0, %v91_v18, 0.0 }
  0xe9   :  { %94 = vadd.xlane.f32.xlu0 %v93_v19 }
  0xf7   :  { %v76_v20 = vpop.permute.xlu1 %75  ;;  %v113_v24 = vpop.permute.xlu0 %112 }
  0xf8   :  { %v78_v21 = vsel %vm35_vm0, %v76_v20, 0.0  ;;  %v115_v25 = vsel %vm35_vm0, %v113_v24, 0.0 }
  0xf9   :  { %79 = vadd.xlane.f32.xlu1 %v78_v21 }
  0xff   :  { %v102_v22 = vpop.permute.xlu1 %101  ;;  %v135_v28 = vpop.permute.xlu0 %134 }
 0x100   :  { %v104_v23 = vsel %vm35_vm0, %v102_v22, 0.0  ;;  %v137_v29 = vsel %vm35_vm0, %v135_v28, 0.0 }
 0x101   :  { %105 = vadd.xlane.f32.xlu2 %v104_v23  ;;  %v68_v32 = vpop.xlane.xlu2 %67 }
 0x107   :  { %v124_v26 = vpop.permute.xlu1 %123 }
 0x108   :  { %v126_v27 = vsel %vm35_vm0, %v124_v26, 0.0 }
 0x109   :  { %116 = vadd.xlane.f32.xlu2 %v115_v25 }
 0x111   :  { %127 = vadd.xlane.f32.xlu2 %v126_v27 }
 0x119   :  { %138 = vadd.xlane.f32.xlu2 %v137_v29 }
 0x12a   :  { %v38_v31 = vpop.xlane.xlu0 %37 }
 0x12b   :  { %v97_v38 = vmul.f32 %v50_v30, %v38_v31 }
 0x132   :  { %v56_v33 = vpop.xlane.xlu0 %55  ;;  %v44_v35 = vpop.xlane.xlu1 %43 }
 0x133   :  { %v82_v37 = vmul.f32 %v44_v35, %v38_v31  ;;  %v108_v39 = vmul.f32 %v50_v30, %v44_v35  ;;  %v130_v44 = vmul.f32 %v68_v32, %v56_v33 }
 0x135   :  { %192 = vrcp.f32 %v82_v37 }
 0x136   :  { %194 = vrcp.f32 %v97_v38 }
 0x137   :  { %196 = vrcp.f32 %v108_v39 }
 0x13a   :  { %v62_v36 = vpop.xlane.xlu0 %61 }
 0x13b   :  { %v119_v42 = vmul.f32 %v62_v36, %v56_v33  ;;  %v193_v49 = vpop.eup %192  ;;  %v141_v50 = vmul.f32 %v68_v32, %v62_v36 }
 0x13c   :  { %v195_v52 = vpop.eup %194 }
 0x13d   :  { %198 = vrcp.f32 %v119_v42  ;;  %v197_v55 = vpop.eup %196 }
 0x13e   :  { %200 = vrcp.f32 %v130_v44 }
 0x13f   :  { %202 = vrcp.f32 %v141_v50 }
 0x143   :  { %v199_v59 = vpop.eup %198 }
 0x144   :  { %v201_v62 = vpop.eup %200 }
 0x145   :  { %v203_v4 = vpop.eup %202 }
 0x15c   :  { %v95_v45 = vpop.xlane.xlu0 %94 }
 0x15d   :  { %v96_v47 = vmul.f32 %v95_v45, %v95_v45 }
 0x15f   :  { %v99_v56 = vmul.f32 %v195_v52, %v96_v47 }
 0x16c   :  { %v80_v43 = vpop.xlane.xlu1 %79 }
 0x16d   :  { %v81_v46 = vmul.f32 %v80_v43, %v80_v43 }
 0x16f   :  { %v84_v53 = vmul.f32 %v193_v49, %v81_v46 }
 0x171   :  { %v100_v60 = vadd.f32 %v99_v56, %v84_v53 }
 0x174   :  { %v106_v34 = vpop.xlane.xlu2 %105 }
 0x175   :  { %v107_v48 = vmul.f32 %v106_v34, %v106_v34 }
 0x177   :  { %v110_v57 = vmul.f32 %v197_v55, %v107_v48 }
 0x179   :  { %v111_v63 = vadd.f32 %v110_v57, %v100_v60 }
 0x17c   :  { %v117_v40 = vpop.xlane.xlu2 %116 }
 0x17d   :  { %v118_v54 = vmul.f32 %v117_v40, %v117_v40 }
 0x17f   :  { %v121_v61 = vmul.f32 %v199_v59, %v118_v54 }
 0x181   :  { %v122_v2 = vadd.f32 %v121_v61, %v111_v63 }
 0x184   :  { %v128_v51 = vpop.xlane.xlu2 %127 }
 0x185   :  { %v129_v58 = vmul.f32 %v128_v51, %v128_v51 }
 0x187   :  { %v132_v0 = vmul.f32 %v201_v62, %v129_v58 }
 0x189   :  { %v133_v5 = vadd.f32 %v132_v0, %v122_v2 }
 0x18c   :  { %v139_v1 = vpop.xlane.xlu2 %138 }
 0x18d   :  { %v140_v3 = vmul.f32 %v139_v1, %v139_v1 }
 0x18f   :  { %v143_v6 = vmul.f32 %v203_v4, %v140_v3 }
 0x191   :  { %v144_v7 = vadd.f32 %v143_v6, %v133_v5 }
 0x193   :  { %v147_v8 = vsel %vm146_vm2, %v144_v7, 0.0 }
 0x194   :  { %v148_v9 = vrot.slane %v147_v8, 4 }
 0x196   :  { %v149_v10 = vadd.f32 %v148_v9, %v147_v8 }
 0x198   :  { %v150_v11 = vrot.slane %v149_v10, 2 }
 0x19a   :  { %v151_v12 = vadd.f32 %v150_v11, %v149_v10 }
 0x19c   :  { %v152_v13 = vrot.slane %v151_v12, 1 }
 0x19e   :  { %v153_v14 = vadd.f32 %v152_v13, %v151_v12 }
 0x1a0   :  { %v154_v16 = vmul.f32 2.0, %v153_v14 }
 0x1a2   :  { %v155_v17 = vadd.f32 %v154_v16, %v145_v15 }
 0x1a4   :  { %157 = vst.msk [vmem:[#allocation2] sm:$0x1] %vm27_vm1, %v155_v17 }
 0x1ab   :  { %v161_v18 = vld [vmem:[#allocation2] sm:$0x1] }
 0x1ac   :  { %v162_v19 = vmul.f32 0.5, %v161_v18 }
 0x1ae   :  { %163 = vst.msk [vmem:[#allocation6] sm:$0x1] %vm27_vm1, %v162_v19 }
 0x1af   :  { %174 = dma.vmem_to_hbm [thread:$0]  %s170_s19, 16, %s172_s22, [#allocation5]  }
 0x1b0   :  { %254 = dma.done.wait [#allocation5], 16  }
 0x1b1   :  { %255 = vsyncadd [#allocation5], 4294967280 }
 0x1b2   :  { %179 = vsyncpa [#allocation4], 1 }
 0x1b3   :  { %180 = vsyncpa [#allocation5], 1 }

</bundles_post_ra>
